<compile_context>
chip_gen: v7x
topology: tpu7x:2x2x1
jax: 0.10.0
libtpu: 0.0.40
codegen_flags: <defaults>
</compile_context>

<pallas_src>
import functools

import jax
import jax.numpy as jnp
from jax import lax
from jax.experimental import pallas as pl
from jax.experimental.pallas import tpu as pltpu


def _l2_normalize(x):
    """F.normalize(x, dim=-1, eps=1e-12): rsqrt of clamped squared norm (EUP)."""
    x = x.astype(jnp.float32)
    sumsq = jnp.sum(x * x, axis=-1, keepdims=True)
    return x * lax.rsqrt(jnp.maximum(sumsq, 1e-24))


def _multiview_contrast_kernel(
        # inputs: anchor (row) tiles, then sample (column) tiles
        h1p_row_ref, h2p_row_ref,
        h1p_col_ref, h2p_col_ref, h1t_col_ref, h2t_col_ref,
        # output: per-row combined loss contribution [tile, 1]
        out_ref,
        # scratch: online-LSE state + positive-pair diagonals (all [tile, 1] f32)
        m_cn1, l_cn1, m_cn2, l_cn2, m_ppt, l_ppt, m_pp, l_pp_l, l_pp_i,
        d_cn1, d_cn2, d_pp,
        *, inv_tl: float, inv_ti: float, beta: float, matmul_dtype):
    i = pl.program_id(0)    # anchor-row tile   ("parallel")
    j = pl.program_id(1)    # sample-column tile ("arbitrary", reduction, last)

    @pl.when(j == 0)
    def _init():
        for m in (m_cn1, m_cn2, m_ppt, m_pp):
            m[...] = jnp.full_like(m, -jnp.inf)
        for l in (l_cn1, l_cn2, l_ppt, l_pp_l, l_pp_i):
            l[...] = jnp.zeros_like(l)

    # Normalize in f32.  Fold 1/tau_loss into operands used at exactly one
    # temperature so the MXU output is already temperature-scaled.
    a1 = _l2_normalize(h1p_row_ref[...])                 # anchor h1_pred (cos units)
    a2 = _l2_normalize(h2p_row_ref[...])                 # anchor h2_pred (cos units)
    s_h2t = _l2_normalize(h2t_col_ref[...]) * inv_tl     # sample for cn1
    s_h1t = _l2_normalize(h1t_col_ref[...]) * inv_tl     # sample for cn2
    s_h1p = _l2_normalize(h1p_col_ref[...]) * inv_tl     # sample for inter_2
    s_h2p = _l2_normalize(h2p_col_ref[...])              # sample for inter_1 + intra (2 taus)

    # Positive pairs live only in the diagonal block (tile_rows == tile_cols):
    # row-wise dot instead of extracting the diagonal of the [T, T] matmul.
    @pl.when(j == i)
    def _diag():
        d_cn1[...] = jnp.sum(a1 * s_h2t, axis=-1, keepdims=True)   # sim units
        d_cn2[...] = jnp.sum(a2 * s_h1t, axis=-1, keepdims=True)   # sim units
        d_pp[...] = jnp.sum(a1 * s_h2p, axis=-1, keepdims=True)    # cos units

    mt = matmul_dtype
    dn = (((1,), (1,)), ((), ()))  # contract on D for both operands (no .T copy)

    def mm(a, s):
        return lax.dot_general(a.astype(mt), s.astype(mt), dn,
                               preferred_element_type=jnp.float32)

    def online_lse(sim, m_ref, l_ref):
        m_new = jnp.maximum(m_ref[...], jnp.max(sim, axis=-1, keepdims=True))
        l_ref[...] = (l_ref[...] * jnp.exp(m_ref[...] - m_new)
                      + jnp.sum(jnp.exp(sim - m_new), axis=-1, keepdims=True))
        m_ref[...] = m_new

    # cross-network 1: anchor h1_pred, sample h2_target (already /tau_l)
    online_lse(mm(a1, s_h2t), m_cn1, l_cn1)
    # cross-network 2: anchor h2_pred, sample h1_target (already /tau_l)
    online_lse(mm(a2, s_h1t), m_cn2, l_cn2)
    # inter-view 2:    anchor h2_pred, sample h1_pred   (already /tau_l)
    online_lse(mm(a2, s_h1p), m_ppt, l_ppt)

    # inter-view 1 + intra: anchor h1_pred, sample h2_pred.  One matmul in
    # cosine units; the two temperatures share one running max (inv_tau > 0).
    cos = mm(a1, s_h2p)
    m_new = jnp.maximum(m_pp[...], jnp.max(cos, axis=-1, keepdims=True))
    delta = cos - m_new
    dm = m_pp[...] - m_new
    l_pp_l[...] = (l_pp_l[...] * jnp.exp(inv_tl * dm)
                   + jnp.sum(jnp.exp(inv_tl * delta), axis=-1, keepdims=True))
    l_pp_i[...] = (l_pp_i[...] * jnp.exp(inv_ti * dm)
                   + jnp.sum(jnp.exp(inv_ti * delta), axis=-1, keepdims=True))
    m_pp[...] = m_new

    @pl.when(j == pl.num_programs(1) - 1)
    def _finalize():
        lse_cn1 = m_cn1[...] + jnp.log(l_cn1[...])
        lse_cn2 = m_cn2[...] + jnp.log(l_cn2[...])
        lse_ppt = m_ppt[...] + jnp.log(l_ppt[...])
        lse_pp_l = inv_tl * m_pp[...] + jnp.log(l_pp_l[...])
        lse_pp_i = inv_ti * m_pp[...] + jnp.log(l_pp_i[...])
        # per-row loss of each InfoNCE term is (lse - positive_sim)
        cross_network = 0.5 * ((lse_cn1 - d_cn1[...]) + (lse_cn2 - d_cn2[...]))
        cross_view = 0.5 * ((lse_pp_l - inv_tl * d_pp[...])
                            + (lse_ppt - inv_tl * d_pp[...])
                            + 2.0 * (lse_pp_i - inv_ti * d_pp[...]))
        out_ref[...] = beta * cross_view + (1.0 - beta) * cross_network


def _pick_tile(n: int, cap: int) -> int:
    """Largest tile <= cap that divides N (multiple of 8); else untiled."""
    if n <= cap:
        return n
    start = cap - cap % 8
    for t in range(start, 0, -8):
        if n % t == 0:
            return t
    return n  # fallback: single block (see TODO at top for pad+mask path)


def multiview_contrast_loss(h1_pred, h2_pred, h1_target, h2_target, *,
                            tau_loss: float, tau_intra: float, beta: float,
                            block_n: int = 256,
                            matmul_dtype=jnp.bfloat16) -> jax.Array:
    """Fused, tiled Pallas computation of the full MultiViewContrast loss."""
    n, d = h1_pred.shape
    tile = _pick_tile(n, block_n)
    num_tiles = n // tile

    kernel = functools.partial(
        _multiview_contrast_kernel,
        inv_tl=1.0 / float(tau_loss), inv_ti=1.0 / float(tau_intra),
        beta=float(beta), matmul_dtype=matmul_dtype)

    row_spec = pl.BlockSpec((tile, d), lambda i, j: (i, 0))   # anchors (fixed over j)
    col_spec = pl.BlockSpec((tile, d), lambda i, j: (j, 0))   # samples (reduction)

    per_row = pl.pallas_call(
        kernel,
        out_shape=jax.ShapeDtypeStruct((n, 1), jnp.float32),
        grid_spec=pltpu.PrefetchScalarGridSpec(
            num_scalar_prefetch=0,
            grid=(num_tiles, num_tiles),
            in_specs=[row_spec, row_spec,                      # h1p, h2p as anchors
                      col_spec, col_spec, col_spec, col_spec],  # h1p, h2p, h1t, h2t as samples
            out_specs=pl.BlockSpec((tile, 1), lambda i, j: (i, 0)),
            scratch_shapes=[pltpu.VMEM((tile, 1), jnp.float32)
                            for _ in range(12)]),
        compiler_params=pltpu.CompilerParams(
            dimension_semantics=("parallel", "arbitrary"),
            vmem_limit_bytes=32 * 1024 * 1024),
    )(h1_pred, h2_pred, h1_pred, h2_pred, h1_target, h2_target)

    # Tiny O(N) final mean; the kernel already combined all 5 terms per row.
    return jnp.sum(per_row) / n


class MultiViewContrastPallas:
    """JAX/Pallas port of MultiViewContrast (mode='L2L')."""

    def __init__(self, tau_loss: float = 0.2, tau_intra: float = 0.4,
                 beta: float = 0.5, mode: str = 'L2L', block_n: int = 256,
                 matmul_dtype=jnp.bfloat16):
        assert mode == 'L2L'
        self.tau_loss = tau_loss      # temperature of `loss`
        self.tau_intra = tau_intra    # temperature of `intra_loss`
        self.beta = beta
        self.mode = mode
        self.block_n = block_n
        self.matmul_dtype = matmul_dtype

    def __call__(self, h1_pred, h2_pred, h1_target, h2_target):
        return multiview_contrast_loss(
            h1_pred, h2_pred, h1_target, h2_target,
            tau_loss=self.tau_loss, tau_intra=self.tau_intra, beta=self.beta,
            block_n=self.block_n, matmul_dtype=self.matmul_dtype)


def _infonce_ref(anchor, sample, tau):
    """Pure-JAX reference for a single InfoNCE term (L2L sampler semantics)."""
    a = anchor / jnp.maximum(
        jnp.linalg.norm(anchor, axis=-1, keepdims=True), 1e-12)
    s = sample / jnp.maximum(
        jnp.linalg.norm(sample, axis=-1, keepdims=True), 1e-12)
    sim = (a @ s.T) / tau
    lse = jax.scipy.special.logsumexp(sim, axis=-1)
    diag = jnp.diagonal(sim)
    return -jnp.mean(diag - lse)


if __name__ == "__main__":
    tl, ti, beta = 0.2, 0.4, 0.5

    def ref_loss(h1p, h2p, h1t, h2t):
        cn = 0.5 * (_infonce_ref(h1p, h2t, tl) + _infonce_ref(h2p, h1t, tl))
        cv = 0.5 * (_infonce_ref(h1p, h2p, tl) + _infonce_ref(h2p, h1p, tl)
                    + 2.0 * _infonce_ref(h1p, h2p, ti))
        return beta * cv + (1.0 - beta) * cn

    key = jax.random.PRNGKey(0)
    keys = jax.random.split(key, 8)

    # Case 1: small, single-block path (grid = (1,1)), f32 MXU -> tight check.
    N, D = 8, 32
    h1p = jax.random.normal(keys[0], (N, D), dtype=jnp.float32)
    h2p = jax.random.normal(keys[1], (N, D), dtype=jnp.float32)
    h1t = jax.random.normal(keys[2], (N, D), dtype=jnp.float32)
    h2t = jax.random.normal(keys[3], (N, D), dtype=jnp.float32)
    model_f32 = MultiViewContrastPallas(tau_loss=tl, tau_intra=ti, beta=beta,
                                        matmul_dtype=jnp.float32)
    out1 = jax.block_until_ready(model_f32(h1p, h2p, h1t, h2t))
    ref1 = ref_loss(h1p, h2p, h1t, h2t)
    assert jnp.allclose(out1, ref1, rtol=1e-5, atol=1e-5), (out1, ref1)

    # Case 2: exercises the tiled online-LSE path (grid = (2,2), tile = 16).
    N2, D2 = 32, 32
    g1p = jax.random.normal(keys[4], (N2, D2), dtype=jnp.float32)
    g2p = jax.random.normal(keys[5], (N2, D2), dtype=jnp.float32)
    g1t = jax.random.normal(keys[6], (N2, D2), dtype=jnp.float32)
    g2t = jax.random.normal(keys[7], (N2, D2), dtype=jnp.float32)
    out2 = jax.block_until_ready(multiview_contrast_loss(
        g1p, g2p, g1t, g2t, tau_loss=tl, tau_intra=ti, beta=beta,
        block_n=16, matmul_dtype=jnp.float32))
    ref2 = ref_loss(g1p, g2p, g1t, g2t)
    assert jnp.allclose(out2, ref2, rtol=1e-5, atol=1e-5), (out2, ref2)

    # Case 3: default bf16 MXU operands (f32 accumulation) -> loose check.
    model_bf16 = MultiViewContrastPallas(tau_loss=tl, tau_intra=ti, beta=beta)
    out3 = jax.block_until_ready(model_bf16(h1p, h2p, h1t, h2t))
    assert jnp.allclose(out3, ref1, rtol=3e-2, atol=3e-2), (out3, ref1)

    print("KERNEL_OK")
</pallas_src>

<mosaic_0001>
module attributes {stable_mosaic.version = 11 : i64} {
  func.func @_multiview_contrast_kernel(%arg0: i32, %arg1: i32, %arg2: memref<8x32xf32, #tpu.memory_space<vmem>>, %arg3: memref<8x32xf32, #tpu.memory_space<vmem>>, %arg4: memref<8x32xf32, #tpu.memory_space<vmem>>, %arg5: memref<8x32xf32, #tpu.memory_space<vmem>>, %arg6: memref<8x32xf32, #tpu.memory_space<vmem>>, %arg7: memref<8x32xf32, #tpu.memory_space<vmem>>, %arg8: memref<8x1xf32, #tpu.memory_space<vmem>>, %arg9: memref<8x1xf32, #tpu.memory_space<vmem>>, %arg10: memref<8x1xf32, #tpu.memory_space<vmem>>, %arg11: memref<8x1xf32, #tpu.memory_space<vmem>>, %arg12: memref<8x1xf32, #tpu.memory_space<vmem>>, %arg13: memref<8x1xf32, #tpu.memory_space<vmem>>, %arg14: memref<8x1xf32, #tpu.memory_space<vmem>>, %arg15: memref<8x1xf32, #tpu.memory_space<vmem>>, %arg16: memref<8x1xf32, #tpu.memory_space<vmem>>, %arg17: memref<8x1xf32, #tpu.memory_space<vmem>>, %arg18: memref<8x1xf32, #tpu.memory_space<vmem>>, %arg19: memref<8x1xf32, #tpu.memory_space<vmem>>, %arg20: memref<8x1xf32, #tpu.memory_space<vmem>>) attributes {dimension_semantics = [#tpu.dimension_semantics<parallel>, #tpu.dimension_semantics<arbitrary>], iteration_bounds = array<i64: 1, 1>, scalar_prefetch = 0 : i64, scratch_operands = 12 : i64, tpu.core_type = #tpu.core_type<tc>, window_params = [{transform_indices = @transform_0, window_bounds = array<i64: 8, 32>}, {transform_indices = @transform_1, window_bounds = array<i64: 8, 32>}, {transform_indices = @transform_2, window_bounds = array<i64: 8, 32>}, {transform_indices = @transform_3, window_bounds = array<i64: 8, 32>}, {transform_indices = @transform_4, window_bounds = array<i64: 8, 32>}, {transform_indices = @transform_5, window_bounds = array<i64: 8, 32>}, {transform_indices = @transform_6, window_bounds = array<i64: 8, 1>}]} {
    %c0_i32 = arith.constant 0 : i32
    %0 = arith.cmpi eq, %arg1, %c0_i32 : i32
    %1 = arith.extui %0 : i1 to i32
    %c0_i32_0 = arith.constant 0 : i32
    %2 = arith.cmpi ne, %1, %c0_i32_0 : i32
    scf.if %2 {
      %cst_90 = arith.constant 0xFF800000 : f32
      %157 = vector.broadcast %cst_90 : f32 to vector<8x1xf32>
      %c0_91 = arith.constant 0 : index
      %c0_92 = arith.constant 0 : index
      %158 = vector.load %arg9[%c0_91, %c0_92] : memref<8x1xf32, #tpu.memory_space<vmem>>, vector<8x1xf32>
      tpu.vector_store %arg9[%c0_91, %c0_92], %157 {strides = array<i32>} : memref<8x1xf32, #tpu.memory_space<vmem>>, vector<8x1xf32>,
      %cst_93 = arith.constant 0xFF800000 : f32
      %159 = vector.broadcast %cst_93 : f32 to vector<8x1xf32>
      %c0_94 = arith.constant 0 : index
      %c0_95 = arith.constant 0 : index
      %160 = vector.load %arg11[%c0_94, %c0_95] : memref<8x1xf32, #tpu.memory_space<vmem>>, vector<8x1xf32>
      tpu.vector_store %arg11[%c0_94, %c0_95], %159 {strides = array<i32>} : memref<8x1xf32, #tpu.memory_space<vmem>>, vector<8x1xf32>,
      %cst_96 = arith.constant 0xFF800000 : f32
      %161 = vector.broadcast %cst_96 : f32 to vector<8x1xf32>
      %c0_97 = arith.constant 0 : index
      %c0_98 = arith.constant 0 : index
      %162 = vector.load %arg13[%c0_97, %c0_98] : memref<8x1xf32, #tpu.memory_space<vmem>>, vector<8x1xf32>
      tpu.vector_store %arg13[%c0_97, %c0_98], %161 {strides = array<i32>} : memref<8x1xf32, #tpu.memory_space<vmem>>, vector<8x1xf32>,
      %cst_99 = arith.constant 0xFF800000 : f32
      %163 = vector.broadcast %cst_99 : f32 to vector<8x1xf32>
      %c0_100 = arith.constant 0 : index
      %c0_101 = arith.constant 0 : index
      %164 = vector.load %arg15[%c0_100, %c0_101] : memref<8x1xf32, #tpu.memory_space<vmem>>, vector<8x1xf32>
      tpu.vector_store %arg15[%c0_100, %c0_101], %163 {strides = array<i32>} : memref<8x1xf32, #tpu.memory_space<vmem>>, vector<8x1xf32>,
      %cst_102 = arith.constant 0.000000e+00 : f32
      %165 = vector.broadcast %cst_102 : f32 to vector<8x1xf32>
      %c0_103 = arith.constant 0 : index
      %c0_104 = arith.constant 0 : index
      %166 = vector.load %arg10[%c0_103, %c0_104] : memref<8x1xf32, #tpu.memory_space<vmem>>, vector<8x1xf32>
      tpu.vector_store %arg10[%c0_103, %c0_104], %165 {strides = array<i32>} : memref<8x1xf32, #tpu.memory_space<vmem>>, vector<8x1xf32>,
      %cst_105 = arith.constant 0.000000e+00 : f32
      %167 = vector.broadcast %cst_105 : f32 to vector<8x1xf32>
      %c0_106 = arith.constant 0 : index
      %c0_107 = arith.constant 0 : index
      %168 = vector.load %arg12[%c0_106, %c0_107] : memref<8x1xf32, #tpu.memory_space<vmem>>, vector<8x1xf32>
      tpu.vector_store %arg12[%c0_106, %c0_107], %167 {strides = array<i32>} : memref<8x1xf32, #tpu.memory_space<vmem>>, vector<8x1xf32>,
      %cst_108 = arith.constant 0.000000e+00 : f32
      %169 = vector.broadcast %cst_108 : f32 to vector<8x1xf32>
      %c0_109 = arith.constant 0 : index
      %c0_110 = arith.constant 0 : index
      %170 = vector.load %arg14[%c0_109, %c0_110] : memref<8x1xf32, #tpu.memory_space<vmem>>, vector<8x1xf32>
      tpu.vector_store %arg14[%c0_109, %c0_110], %169 {strides = array<i32>} : memref<8x1xf32, #tpu.memory_space<vmem>>, vector<8x1xf32>,
      %cst_111 = arith.constant 0.000000e+00 : f32
      %171 = vector.broadcast %cst_111 : f32 to vector<8x1xf32>
      %c0_112 = arith.constant 0 : index
      %c0_113 = arith.constant 0 : index
      %172 = vector.load %arg16[%c0_112, %c0_113] : memref<8x1xf32, #tpu.memory_space<vmem>>, vector<8x1xf32>
      tpu.vector_store %arg16[%c0_112, %c0_113], %171 {strides = array<i32>} : memref<8x1xf32, #tpu.memory_space<vmem>>, vector<8x1xf32>,
      %cst_114 = arith.constant 0.000000e+00 : f32
      %173 = vector.broadcast %cst_114 : f32 to vector<8x1xf32>
      %c0_115 = arith.constant 0 : index
      %c0_116 = arith.constant 0 : index
      %174 = vector.load %arg17[%c0_115, %c0_116] : memref<8x1xf32, #tpu.memory_space<vmem>>, vector<8x1xf32>
      tpu.vector_store %arg17[%c0_115, %c0_116], %173 {strides = array<i32>} : memref<8x1xf32, #tpu.memory_space<vmem>>, vector<8x1xf32>,
    } else {
    }
    %c0 = arith.constant 0 : index
    %c0_1 = arith.constant 0 : index
    %3 = vector.load %arg2[%c0, %c0_1] : memref<8x32xf32, #tpu.memory_space<vmem>>, vector<8x32xf32>
    %4 = arith.mulf %3, %3 : vector<8x32xf32>
    %cst = arith.constant dense<0.000000e+00> : vector<8xf32>
    %5 = vector.multi_reduction <add>, %4, %cst [1] : vector<8x32xf32> to vector<8xf32>
    %6 = vector.shape_cast %5 : vector<8xf32> to vector<8x1xf32>
    %cst_2 = arith.constant 1.000000e-24 : f32
    %7 = vector.broadcast %cst_2 : f32 to vector<8x1xf32>
    %8 = arith.maximumf %6, %7 : vector<8x1xf32>
    %9 = math.rsqrt %8 : vector<8x1xf32>
    %10 = vector.broadcast %9 : vector<8x1xf32> to vector<8x32xf32>
    %11 = arith.mulf %3, %10 : vector<8x32xf32>
    %c0_3 = arith.constant 0 : index
    %c0_4 = arith.constant 0 : index
    %12 = vector.load %arg3[%c0_3, %c0_4] : memref<8x32xf32, #tpu.memory_space<vmem>>, vector<8x32xf32>
    %13 = arith.mulf %12, %12 : vector<8x32xf32>
    %cst_5 = arith.constant dense<0.000000e+00> : vector<8xf32>
    %14 = vector.multi_reduction <add>, %13, %cst_5 [1] : vector<8x32xf32> to vector<8xf32>
    %15 = vector.shape_cast %14 : vector<8xf32> to vector<8x1xf32>
    %cst_6 = arith.constant 1.000000e-24 : f32
    %16 = vector.broadcast %cst_6 : f32 to vector<8x1xf32>
    %17 = arith.maximumf %15, %16 : vector<8x1xf32>
    %18 = math.rsqrt %17 : vector<8x1xf32>
    %19 = vector.broadcast %18 : vector<8x1xf32> to vector<8x32xf32>
    %20 = arith.mulf %12, %19 : vector<8x32xf32>
    %c0_7 = arith.constant 0 : index
    %c0_8 = arith.constant 0 : index
    %21 = vector.load %arg7[%c0_7, %c0_8] : memref<8x32xf32, #tpu.memory_space<vmem>>, vector<8x32xf32>
    %22 = arith.mulf %21, %21 : vector<8x32xf32>
    %cst_9 = arith.constant dense<0.000000e+00> : vector<8xf32>
    %23 = vector.multi_reduction <add>, %22, %cst_9 [1] : vector<8x32xf32> to vector<8xf32>
    %24 = vector.shape_cast %23 : vector<8xf32> to vector<8x1xf32>
    %cst_10 = arith.constant 1.000000e-24 : f32
    %25 = vector.broadcast %cst_10 : f32 to vector<8x1xf32>
    %26 = arith.maximumf %24, %25 : vector<8x1xf32>
    %27 = math.rsqrt %26 : vector<8x1xf32>
    %28 = vector.broadcast %27 : vector<8x1xf32> to vector<8x32xf32>
    %29 = arith.mulf %21, %28 : vector<8x32xf32>
    %cst_11 = arith.constant 5.000000e+00 : f32
    %30 = vector.broadcast %cst_11 : f32 to vector<8x32xf32>
    %31 = arith.mulf %29, %30 : vector<8x32xf32>
    %c0_12 = arith.constant 0 : index
    %c0_13 = arith.constant 0 : index
    %32 = vector.load %arg6[%c0_12, %c0_13] : memref<8x32xf32, #tpu.memory_space<vmem>>, vector<8x32xf32>
    %33 = arith.mulf %32, %32 : vector<8x32xf32>
    %cst_14 = arith.constant dense<0.000000e+00> : vector<8xf32>
    %34 = vector.multi_reduction <add>, %33, %cst_14 [1] : vector<8x32xf32> to vector<8xf32>
    %35 = vector.shape_cast %34 : vector<8xf32> to vector<8x1xf32>
    %cst_15 = arith.constant 1.000000e-24 : f32
    %36 = vector.broadcast %cst_15 : f32 to vector<8x1xf32>
    %37 = arith.maximumf %35, %36 : vector<8x1xf32>
    %38 = math.rsqrt %37 : vector<8x1xf32>
    %39 = vector.broadcast %38 : vector<8x1xf32> to vector<8x32xf32>
    %40 = arith.mulf %32, %39 : vector<8x32xf32>
    %cst_16 = arith.constant 5.000000e+00 : f32
    %41 = vector.broadcast %cst_16 : f32 to vector<8x32xf32>
    %42 = arith.mulf %40, %41 : vector<8x32xf32>
    %c0_17 = arith.constant 0 : index
    %c0_18 = arith.constant 0 : index
    %43 = vector.load %arg4[%c0_17, %c0_18] : memref<8x32xf32, #tpu.memory_space<vmem>>, vector<8x32xf32>
    %44 = arith.mulf %43, %43 : vector<8x32xf32>
    %cst_19 = arith.constant dense<0.000000e+00> : vector<8xf32>
    %45 = vector.multi_reduction <add>, %44, %cst_19 [1] : vector<8x32xf32> to vector<8xf32>
    %46 = vector.shape_cast %45 : vector<8xf32> to vector<8x1xf32>
    %cst_20 = arith.constant 1.000000e-24 : f32
    %47 = vector.broadcast %cst_20 : f32 to vector<8x1xf32>
    %48 = arith.maximumf %46, %47 : vector<8x1xf32>
    %49 = math.rsqrt %48 : vector<8x1xf32>
    %50 = vector.broadcast %49 : vector<8x1xf32> to vector<8x32xf32>
    %51 = arith.mulf %43, %50 : vector<8x32xf32>
    %cst_21 = arith.constant 5.000000e+00 : f32
    %52 = vector.broadcast %cst_21 : f32 to vector<8x32xf32>
    %53 = arith.mulf %51, %52 : vector<8x32xf32>
    %c0_22 = arith.constant 0 : index
    %c0_23 = arith.constant 0 : index
    %54 = vector.load %arg5[%c0_22, %c0_23] : memref<8x32xf32, #tpu.memory_space<vmem>>, vector<8x32xf32>
    %55 = arith.mulf %54, %54 : vector<8x32xf32>
    %cst_24 = arith.constant dense<0.000000e+00> : vector<8xf32>
    %56 = vector.multi_reduction <add>, %55, %cst_24 [1] : vector<8x32xf32> to vector<8xf32>
    %57 = vector.shape_cast %56 : vector<8xf32> to vector<8x1xf32>
    %cst_25 = arith.constant 1.000000e-24 : f32
    %58 = vector.broadcast %cst_25 : f32 to vector<8x1xf32>
    %59 = arith.maximumf %57, %58 : vector<8x1xf32>
    %60 = math.rsqrt %59 : vector<8x1xf32>
    %61 = vector.broadcast %60 : vector<8x1xf32> to vector<8x32xf32>
    %62 = arith.mulf %54, %61 : vector<8x32xf32>
    %63 = arith.cmpi eq, %arg1, %arg0 : i32
    %64 = arith.extui %63 : i1 to i32
    %c0_i32_26 = arith.constant 0 : i32
    %65 = arith.cmpi ne, %64, %c0_i32_26 : i32
    scf.if %65 {
      %157 = arith.mulf %11, %31 : vector<8x32xf32>
      %cst_90 = arith.constant dense<0.000000e+00> : vector<8xf32>
      %158 = vector.multi_reduction <add>, %157, %cst_90 [1] : vector<8x32xf32> to vector<8xf32>
      %159 = vector.shape_cast %158 : vector<8xf32> to vector<8x1xf32>
      %c0_91 = arith.constant 0 : index
      %c0_92 = arith.constant 0 : index
      %160 = vector.load %arg18[%c0_91, %c0_92] : memref<8x1xf32, #tpu.memory_space<vmem>>, vector<8x1xf32>
      tpu.vector_store %arg18[%c0_91, %c0_92], %159 {strides = array<i32>} : memref<8x1xf32, #tpu.memory_space<vmem>>, vector<8x1xf32>,
      %161 = arith.mulf %20, %42 : vector<8x32xf32>
      %cst_93 = arith.constant dense<0.000000e+00> : vector<8xf32>
      %162 = vector.multi_reduction <add>, %161, %cst_93 [1] : vector<8x32xf32> to vector<8xf32>
      %163 = vector.shape_cast %162 : vector<8xf32> to vector<8x1xf32>
      %c0_94 = arith.constant 0 : index
      %c0_95 = arith.constant 0 : index
      %164 = vector.load %arg19[%c0_94, %c0_95] : memref<8x1xf32, #tpu.memory_space<vmem>>, vector<8x1xf32>
      tpu.vector_store %arg19[%c0_94, %c0_95], %163 {strides = array<i32>} : memref<8x1xf32, #tpu.memory_space<vmem>>, vector<8x1xf32>,
      %165 = arith.mulf %11, %62 : vector<8x32xf32>
      %cst_96 = arith.constant dense<0.000000e+00> : vector<8xf32>
      %166 = vector.multi_reduction <add>, %165, %cst_96 [1] : vector<8x32xf32> to vector<8xf32>
      %167 = vector.shape_cast %166 : vector<8xf32> to vector<8x1xf32>
      %c0_97 = arith.constant 0 : index
      %c0_98 = arith.constant 0 : index
      %168 = vector.load %arg20[%c0_97, %c0_98] : memref<8x1xf32, #tpu.memory_space<vmem>>, vector<8x1xf32>
      tpu.vector_store %arg20[%c0_97, %c0_98], %167 {strides = array<i32>} : memref<8x1xf32, #tpu.memory_space<vmem>>, vector<8x1xf32>,
    } else {
    }
    %cst_27 = arith.constant dense<0.000000e+00> : vector<8x8xf32>
    %66 = tpu.matmul %11, %31, %cst_27 {dimension_numbers = #tpu.dot_dimension_numbers<[1], [1], [0], [0], [0, 0, 1, 0], [], []>} : vector<8x32xf32>, vector<8x32xf32>, vector<8x8xf32> -> vector<8x8xf32>
    %c0_28 = arith.constant 0 : index
    %c0_29 = arith.constant 0 : index
    %67 = vector.load %arg9[%c0_28, %c0_29] : memref<8x1xf32, #tpu.memory_space<vmem>>, vector<8x1xf32>
    %cst_30 = arith.constant dense<0xFF800000> : vector<8xf32>
    %68 = vector.multi_reduction <maximumf>, %66, %cst_30 [1] : vector<8x8xf32> to vector<8xf32>
    %69 = vector.shape_cast %68 : vector<8xf32> to vector<8x1xf32>
    %70 = arith.maximumf %67, %69 : vector<8x1xf32>
    %c0_31 = arith.constant 0 : index
    %c0_32 = arith.constant 0 : index
    %71 = vector.load %arg10[%c0_31, %c0_32] : memref<8x1xf32, #tpu.memory_space<vmem>>, vector<8x1xf32>
    %c0_33 = arith.constant 0 : index
    %c0_34 = arith.constant 0 : index
    %72 = vector.load %arg9[%c0_33, %c0_34] : memref<8x1xf32, #tpu.memory_space<vmem>>, vector<8x1xf32>
    %73 = arith.subf %72, %70 : vector<8x1xf32>
    %74 = math.exp %73 : vector<8x1xf32>
    %75 = arith.mulf %71, %74 : vector<8x1xf32>
    %76 = vector.broadcast %70 : vector<8x1xf32> to vector<8x8xf32>
    %77 = arith.subf %66, %76 : vector<8x8xf32>
    %78 = math.exp %77 : vector<8x8xf32>
    %cst_35 = arith.constant dense<0.000000e+00> : vector<8xf32>
    %79 = vector.multi_reduction <add>, %78, %cst_35 [1] : vector<8x8xf32> to vector<8xf32>
    %80 = vector.shape_cast %79 : vector<8xf32> to vector<8x1xf32>
    %81 = arith.addf %75, %80 : vector<8x1xf32>
    %c0_36 = arith.constant 0 : index
    %c0_37 = arith.constant 0 : index
    %82 = vector.load %arg10[%c0_36, %c0_37] : memref<8x1xf32, #tpu.memory_space<vmem>>, vector<8x1xf32>
    tpu.vector_store %arg10[%c0_36, %c0_37], %81 {strides = array<i32>} : memref<8x1xf32, #tpu.memory_space<vmem>>, vector<8x1xf32>,
    %c0_38 = arith.constant 0 : index
    %c0_39 = arith.constant 0 : index
    %83 = vector.load %arg9[%c0_38, %c0_39] : memref<8x1xf32, #tpu.memory_space<vmem>>, vector<8x1xf32>
    tpu.vector_store %arg9[%c0_38, %c0_39], %70 {strides = array<i32>} : memref<8x1xf32, #tpu.memory_space<vmem>>, vector<8x1xf32>,
    %cst_40 = arith.constant dense<0.000000e+00> : vector<8x8xf32>
    %84 = tpu.matmul %20, %42, %cst_40 {dimension_numbers = #tpu.dot_dimension_numbers<[1], [1], [0], [0], [0, 0, 1, 0], [], []>} : vector<8x32xf32>, vector<8x32xf32>, vector<8x8xf32> -> vector<8x8xf32>
    %c0_41 = arith.constant 0 : index
    %c0_42 = arith.constant 0 : index
    %85 = vector.load %arg11[%c0_41, %c0_42] : memref<8x1xf32, #tpu.memory_space<vmem>>, vector<8x1xf32>
    %cst_43 = arith.constant dense<0xFF800000> : vector<8xf32>
    %86 = vector.multi_reduction <maximumf>, %84, %cst_43 [1] : vector<8x8xf32> to vector<8xf32>
    %87 = vector.shape_cast %86 : vector<8xf32> to vector<8x1xf32>
    %88 = arith.maximumf %85, %87 : vector<8x1xf32>
    %c0_44 = arith.constant 0 : index
    %c0_45 = arith.constant 0 : index
    %89 = vector.load %arg12[%c0_44, %c0_45] : memref<8x1xf32, #tpu.memory_space<vmem>>, vector<8x1xf32>
    %c0_46 = arith.constant 0 : index
    %c0_47 = arith.constant 0 : index
    %90 = vector.load %arg11[%c0_46, %c0_47] : memref<8x1xf32, #tpu.memory_space<vmem>>, vector<8x1xf32>
    %91 = arith.subf %90, %88 : vector<8x1xf32>
    %92 = math.exp %91 : vector<8x1xf32>
    %93 = arith.mulf %89, %92 : vector<8x1xf32>
    %94 = vector.broadcast %88 : vector<8x1xf32> to vector<8x8xf32>
    %95 = arith.subf %84, %94 : vector<8x8xf32>
    %96 = math.exp %95 : vector<8x8xf32>
    %cst_48 = arith.constant dense<0.000000e+00> : vector<8xf32>
    %97 = vector.multi_reduction <add>, %96, %cst_48 [1] : vector<8x8xf32> to vector<8xf32>
    %98 = vector.shape_cast %97 : vector<8xf32> to vector<8x1xf32>
    %99 = arith.addf %93, %98 : vector<8x1xf32>
    %c0_49 = arith.constant 0 : index
    %c0_50 = arith.constant 0 : index
    %100 = vector.load %arg12[%c0_49, %c0_50] : memref<8x1xf32, #tpu.memory_space<vmem>>, vector<8x1xf32>
    tpu.vector_store %arg12[%c0_49, %c0_50], %99 {strides = array<i32>} : memref<8x1xf32, #tpu.memory_space<vmem>>, vector<8x1xf32>,
    %c0_51 = arith.constant 0 : index
    %c0_52 = arith.constant 0 : index
    %101 = vector.load %arg11[%c0_51, %c0_52] : memref<8x1xf32, #tpu.memory_space<vmem>>, vector<8x1xf32>
    tpu.vector_store %arg11[%c0_51, %c0_52], %88 {strides = array<i32>} : memref<8x1xf32, #tpu.memory_space<vmem>>, vector<8x1xf32>,
    %cst_53 = arith.constant dense<0.000000e+00> : vector<8x8xf32>
    %102 = tpu.matmul %20, %53, %cst_53 {dimension_numbers = #tpu.dot_dimension_numbers<[1], [1], [0], [0], [0, 0, 1, 0], [], []>} : vector<8x32xf32>, vector<8x32xf32>, vector<8x8xf32> -> vector<8x8xf32>
    %c0_54 = arith.constant 0 : index
    %c0_55 = arith.constant 0 : index
    %103 = vector.load %arg13[%c0_54, %c0_55] : memref<8x1xf32, #tpu.memory_space<vmem>>, vector<8x1xf32>
    %cst_56 = arith.constant dense<0xFF800000> : vector<8xf32>
    %104 = vector.multi_reduction <maximumf>, %102, %cst_56 [1] : vector<8x8xf32> to vector<8xf32>
    %105 = vector.shape_cast %104 : vector<8xf32> to vector<8x1xf32>
    %106 = arith.maximumf %103, %105 : vector<8x1xf32>
    %c0_57 = arith.constant 0 : index
    %c0_58 = arith.constant 0 : index
    %107 = vector.load %arg14[%c0_57, %c0_58] : memref<8x1xf32, #tpu.memory_space<vmem>>, vector<8x1xf32>
    %c0_59 = arith.constant 0 : index
    %c0_60 = arith.constant 0 : index
    %108 = vector.load %arg13[%c0_59, %c0_60] : memref<8x1xf32, #tpu.memory_space<vmem>>, vector<8x1xf32>
    %109 = arith.subf %108, %106 : vector<8x1xf32>
    %110 = math.exp %109 : vector<8x1xf32>
    %111 = arith.mulf %107, %110 : vector<8x1xf32>
    %112 = vector.broadcast %106 : vector<8x1xf32> to vector<8x8xf32>
    %113 = arith.subf %102, %112 : vector<8x8xf32>
    %114 = math.exp %113 : vector<8x8xf32>
    %cst_61 = arith.constant dense<0.000000e+00> : vector<8xf32>
    %115 = vector.multi_reduction <add>, %114, %cst_61 [1] : vector<8x8xf32> to vector<8xf32>
    %116 = vector.shape_cast %115 : vector<8xf32> to vector<8x1xf32>
    %117 = arith.addf %111, %116 : vector<8x1xf32>
    %c0_62 = arith.constant 0 : index
    %c0_63 = arith.constant 0 : index
    %118 = vector.load %arg14[%c0_62, %c0_63] : memref<8x1xf32, #tpu.memory_space<vmem>>, vector<8x1xf32>
    tpu.vector_store %arg14[%c0_62, %c0_63], %117 {strides = array<i32>} : memref<8x1xf32, #tpu.memory_space<vmem>>, vector<8x1xf32>,
    %c0_64 = arith.constant 0 : index
    %c0_65 = arith.constant 0 : index
    %119 = vector.load %arg13[%c0_64, %c0_65] : memref<8x1xf32, #tpu.memory_space<vmem>>, vector<8x1xf32>
    tpu.vector_store %arg13[%c0_64, %c0_65], %106 {strides = array<i32>} : memref<8x1xf32, #tpu.memory_space<vmem>>, vector<8x1xf32>,
    %cst_66 = arith.constant dense<0.000000e+00> : vector<8x8xf32>
    %120 = tpu.matmul %11, %62, %cst_66 {dimension_numbers = #tpu.dot_dimension_numbers<[1], [1], [0], [0], [0, 0, 1, 0], [], []>} : vector<8x32xf32>, vector<8x32xf32>, vector<8x8xf32> -> vector<8x8xf32>
    %c0_67 = arith.constant 0 : index
    %c0_68 = arith.constant 0 : index
    %121 = vector.load %arg15[%c0_67, %c0_68] : memref<8x1xf32, #tpu.memory_space<vmem>>, vector<8x1xf32>
    %cst_69 = arith.constant dense<0xFF800000> : vector<8xf32>
    %122 = vector.multi_reduction <maximumf>, %120, %cst_69 [1] : vector<8x8xf32> to vector<8xf32>
    %123 = vector.shape_cast %122 : vector<8xf32> to vector<8x1xf32>
    %124 = arith.maximumf %121, %123 : vector<8x1xf32>
    %125 = vector.broadcast %124 : vector<8x1xf32> to vector<8x8xf32>
    %126 = arith.subf %120, %125 : vector<8x8xf32>
    %c0_70 = arith.constant 0 : index
    %c0_71 = arith.constant 0 : index
    %127 = vector.load %arg15[%c0_70, %c0_71] : memref<8x1xf32, #tpu.memory_space<vmem>>, vector<8x1xf32>
    %128 = arith.subf %127, %124 : vector<8x1xf32>
    %c0_72 = arith.constant 0 : index
    %c0_73 = arith.constant 0 : index
    %129 = vector.load %arg16[%c0_72, %c0_73] : memref<8x1xf32, #tpu.memory_space<vmem>>, vector<8x1xf32>
    %cst_74 = arith.constant 5.000000e+00 : f32
    %130 = vector.broadcast %cst_74 : f32 to vector<8x1xf32>
    %131 = arith.mulf %130, %128 : vector<8x1xf32>
    %132 = math.exp %131 : vector<8x1xf32>
    %133 = arith.mulf %129, %132 : vector<8x1xf32>
    %cst_75 = arith.constant 5.000000e+00 : f32
    %134 = vector.broadcast %cst_75 : f32 to vector<8x8xf32>
    %135 = arith.mulf %134, %126 : vector<8x8xf32>
    %136 = math.exp %135 : vector<8x8xf32>
    %cst_76 = arith.constant dense<0.000000e+00> : vector<8xf32>
    %137 = vector.multi_reduction <add>, %136, %cst_76 [1] : vector<8x8xf32> to vector<8xf32>
    %138 = vector.shape_cast %137 : vector<8xf32> to vector<8x1xf32>
    %139 = arith.addf %133, %138 : vector<8x1xf32>
    %c0_77 = arith.constant 0 : index
    %c0_78 = arith.constant 0 : index
    %140 = vector.load %arg16[%c0_77, %c0_78] : memref<8x1xf32, #tpu.memory_space<vmem>>, vector<8x1xf32>
    tpu.vector_store %arg16[%c0_77, %c0_78], %139 {strides = array<i32>} : memref<8x1xf32, #tpu.memory_space<vmem>>, vector<8x1xf32>,
    %c0_79 = arith.constant 0 : index
    %c0_80 = arith.constant 0 : index
    %141 = vector.load %arg17[%c0_79, %c0_80] : memref<8x1xf32, #tpu.memory_space<vmem>>, vector<8x1xf32>
    %cst_81 = arith.constant 2.500000e+00 : f32
    %142 = vector.broadcast %cst_81 : f32 to vector<8x1xf32>
    %143 = arith.mulf %142, %128 : vector<8x1xf32>
    %144 = math.exp %143 : vector<8x1xf32>
    %145 = arith.mulf %141, %144 : vector<8x1xf32>
    %cst_82 = arith.constant 2.500000e+00 : f32
    %146 = vector.broadcast %cst_82 : f32 to vector<8x8xf32>
    %147 = arith.mulf %146, %126 : vector<8x8xf32>
    %148 = math.exp %147 : vector<8x8xf32>
    %cst_83 = arith.constant dense<0.000000e+00> : vector<8xf32>
    %149 = vector.multi_reduction <add>, %148, %cst_83 [1] : vector<8x8xf32> to vector<8xf32>
    %150 = vector.shape_cast %149 : vector<8xf32> to vector<8x1xf32>
    %151 = arith.addf %145, %150 : vector<8x1xf32>
    %c0_84 = arith.constant 0 : index
    %c0_85 = arith.constant 0 : index
    %152 = vector.load %arg17[%c0_84, %c0_85] : memref<8x1xf32, #tpu.memory_space<vmem>>, vector<8x1xf32>
    tpu.vector_store %arg17[%c0_84, %c0_85], %151 {strides = array<i32>} : memref<8x1xf32, #tpu.memory_space<vmem>>, vector<8x1xf32>,
    %c0_86 = arith.constant 0 : index
    %c0_87 = arith.constant 0 : index
    %153 = vector.load %arg15[%c0_86, %c0_87] : memref<8x1xf32, #tpu.memory_space<vmem>>, vector<8x1xf32>
    tpu.vector_store %arg15[%c0_86, %c0_87], %124 {strides = array<i32>} : memref<8x1xf32, #tpu.memory_space<vmem>>, vector<8x1xf32>,
    %c0_i32_88 = arith.constant 0 : i32
    %154 = arith.cmpi eq, %arg1, %c0_i32_88 : i32
    %155 = arith.extui %154 : i1 to i32
    %c0_i32_89 = arith.constant 0 : i32
    %156 = arith.cmpi ne, %155, %c0_i32_89 : i32
    scf.if %156 {
      %c0_90 = arith.constant 0 : index
      %c0_91 = arith.constant 0 : index
      %157 = vector.load %arg9[%c0_90, %c0_91] : memref<8x1xf32, #tpu.memory_space<vmem>>, vector<8x1xf32>
      %c0_92 = arith.constant 0 : index
      %c0_93 = arith.constant 0 : index
      %158 = vector.load %arg10[%c0_92, %c0_93] : memref<8x1xf32, #tpu.memory_space<vmem>>, vector<8x1xf32>
      %159 = math.log %158 : vector<8x1xf32>
      %160 = arith.addf %157, %159 : vector<8x1xf32>
      %c0_94 = arith.constant 0 : index
      %c0_95 = arith.constant 0 : index
      %161 = vector.load %arg11[%c0_94, %c0_95] : memref<8x1xf32, #tpu.memory_space<vmem>>, vector<8x1xf32>
      %c0_96 = arith.constant 0 : index
      %c0_97 = arith.constant 0 : index
      %162 = vector.load %arg12[%c0_96, %c0_97] : memref<8x1xf32, #tpu.memory_space<vmem>>, vector<8x1xf32>
      %163 = math.log %162 : vector<8x1xf32>
      %164 = arith.addf %161, %163 : vector<8x1xf32>
      %c0_98 = arith.constant 0 : index
      %c0_99 = arith.constant 0 : index
      %165 = vector.load %arg13[%c0_98, %c0_99] : memref<8x1xf32, #tpu.memory_space<vmem>>, vector<8x1xf32>
      %c0_100 = arith.constant 0 : index
      %c0_101 = arith.constant 0 : index
      %166 = vector.load %arg14[%c0_100, %c0_101] : memref<8x1xf32, #tpu.memory_space<vmem>>, vector<8x1xf32>
      %167 = math.log %166 : vector<8x1xf32>
      %168 = arith.addf %165, %167 : vector<8x1xf32>
      %c0_102 = arith.constant 0 : index
      %c0_103 = arith.constant 0 : index
      %169 = vector.load %arg15[%c0_102, %c0_103] : memref<8x1xf32, #tpu.memory_space<vmem>>, vector<8x1xf32>
      %cst_104 = arith.constant 5.000000e+00 : f32
      %170 = vector.broadcast %cst_104 : f32 to vector<8x1xf32>
      %171 = arith.mulf %170, %169 : vector<8x1xf32>
      %c0_105 = arith.constant 0 : index
      %c0_106 = arith.constant 0 : index
      %172 = vector.load %arg16[%c0_105, %c0_106] : memref<8x1xf32, #tpu.memory_space<vmem>>, vector<8x1xf32>
      %173 = math.log %172 : vector<8x1xf32>
      %174 = arith.addf %171, %173 : vector<8x1xf32>
      %c0_107 = arith.constant 0 : index
      %c0_108 = arith.constant 0 : index
      %175 = vector.load %arg15[%c0_107, %c0_108] : memref<8x1xf32, #tpu.memory_space<vmem>>, vector<8x1xf32>
      %cst_109 = arith.constant 2.500000e+00 : f32
      %176 = vector.broadcast %cst_109 : f32 to vector<8x1xf32>
      %177 = arith.mulf %176, %175 : vector<8x1xf32>
      %c0_110 = arith.constant 0 : index
      %c0_111 = arith.constant 0 : index
      %178 = vector.load %arg17[%c0_110, %c0_111] : memref<8x1xf32, #tpu.memory_space<vmem>>, vector<8x1xf32>
      %179 = math.log %178 : vector<8x1xf32>
      %180 = arith.addf %177, %179 : vector<8x1xf32>
      %c0_112 = arith.constant 0 : index
      %c0_113 = arith.constant 0 : index
      %181 = vector.load %arg18[%c0_112, %c0_113] : memref<8x1xf32, #tpu.memory_space<vmem>>, vector<8x1xf32>
      %182 = arith.subf %160, %181 : vector<8x1xf32>
      %c0_114 = arith.constant 0 : index
      %c0_115 = arith.constant 0 : index
      %183 = vector.load %arg19[%c0_114, %c0_115] : memref<8x1xf32, #tpu.memory_space<vmem>>, vector<8x1xf32>
      %184 = arith.subf %164, %183 : vector<8x1xf32>
      %185 = arith.addf %182, %184 : vector<8x1xf32>
      %cst_116 = arith.constant 5.000000e-01 : f32
      %186 = vector.broadcast %cst_116 : f32 to vector<8x1xf32>
      %187 = arith.mulf %186, %185 : vector<8x1xf32>
      %c0_117 = arith.constant 0 : index
      %c0_118 = arith.constant 0 : index
      %188 = vector.load %arg20[%c0_117, %c0_118] : memref<8x1xf32, #tpu.memory_space<vmem>>, vector<8x1xf32>
      %cst_119 = arith.constant 5.000000e+00 : f32
      %189 = vector.broadcast %cst_119 : f32 to vector<8x1xf32>
      %190 = arith.mulf %189, %188 : vector<8x1xf32>
      %191 = arith.subf %174, %190 : vector<8x1xf32>
      %c0_120 = arith.constant 0 : index
      %c0_121 = arith.constant 0 : index
      %192 = vector.load %arg20[%c0_120, %c0_121] : memref<8x1xf32, #tpu.memory_space<vmem>>, vector<8x1xf32>
      %cst_122 = arith.constant 5.000000e+00 : f32
      %193 = vector.broadcast %cst_122 : f32 to vector<8x1xf32>
      %194 = arith.mulf %193, %192 : vector<8x1xf32>
      %195 = arith.subf %168, %194 : vector<8x1xf32>
      %196 = arith.addf %191, %195 : vector<8x1xf32>
      %c0_123 = arith.constant 0 : index
      %c0_124 = arith.constant 0 : index
      %197 = vector.load %arg20[%c0_123, %c0_124] : memref<8x1xf32, #tpu.memory_space<vmem>>, vector<8x1xf32>
      %cst_125 = arith.constant 2.500000e+00 : f32
      %198 = vector.broadcast %cst_125 : f32 to vector<8x1xf32>
      %199 = arith.mulf %198, %197 : vector<8x1xf32>
      %200 = arith.subf %180, %199 : vector<8x1xf32>
      %cst_126 = arith.constant 2.000000e+00 : f32
      %201 = vector.broadcast %cst_126 : f32 to vector<8x1xf32>
      %202 = arith.mulf %201, %200 : vector<8x1xf32>
      %203 = arith.addf %196, %202 : vector<8x1xf32>
      %cst_127 = arith.constant 5.000000e-01 : f32
      %204 = vector.broadcast %cst_127 : f32 to vector<8x1xf32>
      %205 = arith.mulf %204, %203 : vector<8x1xf32>
      %cst_128 = arith.constant 5.000000e-01 : f32
      %206 = vector.broadcast %cst_128 : f32 to vector<8x1xf32>
      %207 = arith.mulf %206, %205 : vector<8x1xf32>
      %cst_129 = arith.constant 5.000000e-01 : f32
      %208 = vector.broadcast %cst_129 : f32 to vector<8x1xf32>
      %209 = arith.mulf %208, %187 : vector<8x1xf32>
      %210 = arith.addf %207, %209 : vector<8x1xf32>
      %c0_130 = arith.constant 0 : index
      %c0_131 = arith.constant 0 : index
      %211 = vector.load %arg8[%c0_130, %c0_131] : memref<8x1xf32, #tpu.memory_space<vmem>>, vector<8x1xf32>
      tpu.vector_store %arg8[%c0_130, %c0_131], %210 {strides = array<i32>} : memref<8x1xf32, #tpu.memory_space<vmem>>, vector<8x1xf32>,
    } else {
    }
    return
  }
  func.func @transform_0(%arg0: i32, %arg1: i32) -> (i32, i32) {
    %c0_i32 = arith.constant 0 : i32
    %c0_i32_0 = arith.constant 0 : i32
    return %arg0, %c0_i32 : i32, i32
  }
  func.func @transform_1(%arg0: i32, %arg1: i32) -> (i32, i32) {
    %c0_i32 = arith.constant 0 : i32
    %c0_i32_0 = arith.constant 0 : i32
    return %arg0, %c0_i32 : i32, i32
  }
  func.func @transform_2(%arg0: i32, %arg1: i32) -> (i32, i32) {
    %c0_i32 = arith.constant 0 : i32
    %c0_i32_0 = arith.constant 0 : i32
    return %arg1, %c0_i32 : i32, i32
  }
  func.func @transform_3(%arg0: i32, %arg1: i32) -> (i32, i32) {
    %c0_i32 = arith.constant 0 : i32
    %c0_i32_0 = arith.constant 0 : i32
    return %arg1, %c0_i32 : i32, i32
  }
  func.func @transform_4(%arg0: i32, %arg1: i32) -> (i32, i32) {
    %c0_i32 = arith.constant 0 : i32
    %c0_i32_0 = arith.constant 0 : i32
    return %arg1, %c0_i32 : i32, i32
  }
  func.func @transform_5(%arg0: i32, %arg1: i32) -> (i32, i32) {
    %c0_i32 = arith.constant 0 : i32
    %c0_i32_0 = arith.constant 0 : i32
    return %arg1, %c0_i32 : i32, i32
  }
  func.func @transform_6(%arg0: i32, %arg1: i32) -> (i32, i32) {
    %c0_i32 = arith.constant 0 : i32
    %c0_i32_0 = arith.constant 0 : i32
    return %arg0, %c0_i32 : i32, i32
  }
}

</mosaic_0001>

<bundles_post_ra>
// kernel: tpu_custom_call.1
= control target key start
LH: loop header
LB: loop body
LE: loop exit
PB: predicated region body
PF: predicated region fallthrough
CT: control target
= control target key end

     0   :  { %11 = vsyncpa [#allocation15], 0  ;;  %s1004_s0 = inlined_call_operand.hbm [shape: f32[8,32], index: 0, kind: input, shape index: {}]   ;;  %s1005_s1 = inlined_call_operand.hbm [shape: f32[8,32], index: 1, kind: input, shape index: {}]   ;;  %s1006_s2 = inlined_call_operand.hbm [shape: f32[8,32], index: 2, kind: input, shape index: {}]   ;;  %s1007_s3 = inlined_call_operand.vmem [shape: f32[8,32], index: 3, kind: input, shape index: {}]   ;;  %s1008_s4 = inlined_call_operand.hbm [shape: f32[8,32], index: 4, kind: input, shape index: {}]   ;;  %s1009_s5 = inlined_call_operand.vmem [shape: f32[8,32], index: 5, kind: input, shape index: {}]   ;;  %s1010_s6 = inlined_call_operand.vmem [shape: f32[8,1], index: 6, kind: output, shape index: {}]  }
   0x1   :  { %12 = vsyncpa [#allocation17], 0 }
   0x2   :  { %13 = vsyncpa [#allocation20], 0  ;;  %s805_s21 = smov [#allocation16]   ;;  %s806_s23 = smov [#allocation14]  }
   0x3   :  { %s30_s22 = sshll.u32 %s805_s21, 4  ;;  %s20_s24 = sshll.u32 %s806_s23, 4  ;;  %s31_s22 = int_to_ptr.vmem [resolvable:$true] %s30_s22  ;;  %s21_s24 = int_to_ptr.vmem [resolvable:$true] %s20_s24 }
   0x4   :  { %s711_s27 = scalar_lea.hbm %s1005_s1, 128 }
   0x5   :  { %p712_p0 = scmp.ne.s32.totalorder %s1005_s1, %s711_s27  ;;  %p715_p1 = scmp.lt.u32.totalorder %s711_s27, %s1005_s1 }
   0x7   :  { %p717_p2 = pnand %p715_p1, %p712_p0 }
   0x9   :  { %720 = shalt.err (!%p717_p2)
}
   0xa   :  { %s721_s8 = scalar_lea.vmem %s31_s22, 128  ;;  %p726_p4 = scmp.lt.s32.totalorder %s31_s22, %s31_s22 }
   0xb   :  { %p722_p3 = scmp.ne.s32.totalorder %s31_s22, %s721_s8  ;;  %p727_p5 = scmp.lt.s32.totalorder %s721_s8, %s721_s8 }
   0xd   :  { %p728_p6 = por %p727_p5, %p726_p4 }
   0xf   :  { %p729_p7 = pnand %p728_p6, %p722_p3 }
  0x11   :  { %732 = shalt.err (!%p729_p7)
}
  0x12   :  { %33 = dma.hbm_to_vmem [thread:$0]  %s1005_s1, 128, %s31_s22, [#allocation17]  }
  0x13   :  { %s733_s13 = scalar_lea.hbm %s1004_s0, 128 }
  0x14   :  { %p734_p8 = scmp.ne.s32.totalorder %s1004_s0, %s733_s13  ;;  %p737_p9 = scmp.lt.u32.totalorder %s733_s13, %s1004_s0 }
  0x16   :  { %p739_p10 = pnand %p737_p9, %p734_p8 }
  0x18   :  { %742 = shalt.err (!%p739_p10)
}
  0x19   :  { %s743_s18 = scalar_lea.vmem %s21_s24, 128  ;;  %p748_p12 = scmp.lt.s32.totalorder %s21_s24, %s21_s24 }
  0x1a   :  { %p744_p11 = scmp.ne.s32.totalorder %s21_s24, %s743_s18  ;;  %p749_p13 = scmp.lt.s32.totalorder %s743_s18, %s743_s18 }
  0x1c   :  { %p750_p0 = por %p749_p13, %p748_p12 }
  0x1e   :  { %p751_p1 = pnand %p750_p0, %p744_p11 }
  0x20   :  { %754 = shalt.err (!%p751_p1)
}
  0x21   :  { %23 = dma.hbm_to_vmem [thread:$0]  %s1004_s0, 128, %s21_s24, [#allocation15]  }
  0x22   :  { %s807_s20 = smov [#allocation18]   ;;  %s808_s22 = smov [#allocation19]  }
  0x23   :  { %s40_s21 = sshll.u32 %s807_s20, 4  ;;  %s52_s23 = sshll.u32 %s808_s22, 4  ;;  %s41_s21 = int_to_ptr.vmem [resolvable:$true] %s40_s21  ;;  %s53_s23 = int_to_ptr.vmem [resolvable:$true] %s52_s23 }
  0x24   :  { %s755_s27 = scalar_lea.hbm %s1006_s2, 128 }
  0x25   :  { %p756_p2 = scmp.ne.s32.totalorder %s1006_s2, %s755_s27  ;;  %p759_p3 = scmp.lt.u32.totalorder %s755_s27, %s1006_s2 }
  0x27   :  { %p761_p4 = pnand %p759_p3, %p756_p2 }
  0x29   :  { %764 = shalt.err (!%p761_p4)
}
  0x2a   :  { %s765_s0 = scalar_lea.vmem %s41_s21, 128  ;;  %p770_p6 = scmp.lt.s32.totalorder %s41_s21, %s41_s21 }
  0x2b   :  { %p766_p5 = scmp.ne.s32.totalorder %s41_s21, %s765_s0  ;;  %p771_p7 = scmp.lt.s32.totalorder %s765_s0, %s765_s0 }
  0x2d   :  { %p772_p8 = por %p771_p7, %p770_p6 }
  0x2f   :  { %p773_p9 = pnand %p772_p8, %p766_p5 }
  0x31   :  { %776 = shalt.err (!%p773_p9)
}
  0x32   :  { %43 = dma.hbm_to_vmem [thread:$0]  %s1006_s2, 128, %s41_s21, [#allocation17]  }
  0x33   :  { %s777_s11 = scalar_lea.hbm %s1008_s4, 128 }
  0x34   :  { %p778_p10 = scmp.ne.s32.totalorder %s1008_s4, %s777_s11  ;;  %p781_p11 = scmp.lt.u32.totalorder %s777_s11, %s1008_s4 }
  0x36   :  { %p783_p12 = pnand %p781_p11, %p778_p10 }
  0x38   :  { %786 = shalt.err (!%p783_p12)
}
  0x39   :  { %s787_s16 = scalar_lea.vmem %s53_s23, 128  ;;  %p792_p0 = scmp.lt.s32.totalorder %s53_s23, %s53_s23 }
  0x3a   :  { %p788_p13 = scmp.ne.s32.totalorder %s53_s23, %s787_s16  ;;  %p793_p1 = scmp.lt.s32.totalorder %s787_s16, %s787_s16 }
  0x3c   :  { %p794_p2 = por %p793_p1, %p792_p0 }
  0x3e   :  { %p795_p3 = pnand %p794_p2, %p788_p13 }
  0x40   :  { %798 = shalt.err (!%p795_p3)
}
  0x41   :  { %55 = dma.hbm_to_vmem [thread:$0]  %s1008_s4, 128, %s53_s23, [#allocation20]  }
  0x42   :  { %799 = dma.done.wait [#allocation15], 128  }
  0x43   :  { %800 = vsyncadd [#allocation15], 4294967168 }
  0x44   :  { %801 = dma.done.wait [#allocation17], 256  }
  0x45   :  { %802 = vsyncadd [#allocation17], 4294967040 }
  0x46   :  { %803 = dma.done.wait [#allocation20], 128  }
  0x47   :  { %804 = vsyncadd [#allocation20], 4294967168  ;;  %vm86_vm0 = vcmask 261120   ;;  %v110_v0 = vld [vmem:[#allocation19] sm:$0xff]  ;;  %v93_v1 = vld [vmem:[#allocation16] sm:$0xff]  ;;  %v809_v18 = vmov 0.0  }
  0x48   :  { %v101_v2 = vld [vmem:[%s1009_s5] sm:$0xff]  ;;  %v111_v3 = vmul.f32 %v110_v0, %v110_v0  ;;  %v94_v4 = vmul.f32 %v93_v1, %v93_v1  ;;  %v119_v6 = vld [vmem:[#allocation18] sm:$0xff]  ;;  %644 = vmatprep.subr.mxu1 %v809_v18  ;;  %639 = vmatprep.subr.mxu0 %v809_v18  ;;  %vm810_vm1 = vmmov 0   ;;  %vm74_vm2 = vcmask 7168  }
  0x49   :  { %v102_v5 = vmul.f32 %v101_v2, %v101_v2  ;;  %v120_v7 = vmul.f32 %v119_v6, %v119_v6  ;;  %v128_v8 = vld [vmem:[%s1007_s3] sm:$0xff]  ;;  %646 = vmatprep.mubr.msk.f32.mxu1 %vm810_vm1, %v809_v18  ;;  %641 = vmatprep.mubr.msk.f32.mxu0 %vm810_vm1, %v809_v18  ;;  %v811_v49 = vmov -inf   ;;  %79 = vst.msk [vmem:[#allocation3] sm:$0xff] %vm74_vm2, %v809_v18  ;;  %80 = vst.msk [vmem:[#allocation5] sm:$0xff] %vm74_vm2, %v809_v18  ;;  %vm233_vm3 = vcmask 64512  }
  0x4a   :  { %v84_v9 = vld [vmem:[#allocation14] sm:$0xff]  ;;  %v112_v10 = vsel %vm86_vm0, %v111_v3, 0.0  ;;  %v95_v11 = vsel %vm86_vm0, %v94_v4, 0.0  ;;  %v129_v14 = vmul.f32 %v128_v8, %v128_v8  ;;  %78 = vst.msk [vmem:[#allocation8] sm:$0xff] %vm74_vm2, %v811_v49  ;;  %75 = vst.msk [vmem:[#allocation2] sm:$0xff] %vm74_vm2, %v811_v49  ;;  %v812_v62 = vmov 0  }
  0x4b   :  { %113 = vadd.xlane.f32.xlu0 %v112_v10  ;;  %96 = vadd.xlane.f32.xlu1 %v95_v11  ;;  %v103_v12 = vsel %vm86_vm0, %v102_v5, 0.0  ;;  %v121_v13 = vsel %vm86_vm0, %v120_v7, 0.0  ;;  %v85_v15 = vmul.f32 %v84_v9, %v84_v9  ;;  %76 = vst.msk [vmem:[#allocation4] sm:$0xff] %vm74_vm2, %v811_v49  ;;  %77 = vst.msk [vmem:[#allocation6] sm:$0xff] %vm74_vm2, %v811_v49 }
  0x4c   :  { %v130_v16 = vsel %vm86_vm0, %v129_v14, 0.0  ;;  %81 = vst.msk [vmem:[#allocation7] sm:$0xff] %vm74_vm2, %v809_v18  ;;  %82 = vst.msk [vmem:[#allocation9] sm:$0xff] %vm74_vm2, %v809_v18  ;;  %667 = vset.pattern.permute.xlu0 %v812_v62  ;;  %668 = vset.pattern.permute.xlu1 %v812_v62 }
  0x4d   :  { %v87_v17 = vsel %vm86_vm0, %v85_v15, 0.0  ;;  %83 = vst.msk [vmem:[#allocation10] sm:$0xff] %vm74_vm2, %v809_v18 }
  0x4f   :  { %104 = vadd.xlane.f32.xlu0 %v103_v12  ;;  %122 = vadd.xlane.f32.xlu1 %v121_v13 }
  0x51   :  { %v528_v63 = vld [vmem:[#allocation8] sm:$0xff]  ;;  %v960_v4 = vld [vmem:[#allocation2] sm:$0xff] }
  0x52   :  { %v334_v10 = vld [vmem:[#allocation4] sm:$0xff] }
  0x53   :  { %131 = vadd.xlane.f32.xlu0 %v130_v16  ;;  %88 = vadd.xlane.f32.xlu1 %v87_v17 }
  0xd8   :  { %v114_v19 = vpop.xlane.xlu0 %113  ;;  %v97_v20 = vpop.xlane.xlu1 %96 }
  0xd9   :  { %v115_v21 = vmax.f32 %v114_v19, 1e-24  ;;  %v98_v22 = vmax.f32 %v97_v20, 1e-24 }
  0xdb   :  { %669 = vrsqrt.f32 %v115_v21 }
  0xdc   :  { %671 = vrsqrt.f32 %v98_v22  ;;  %v105_v23 = vpop.xlane.xlu0 %104  ;;  %v123_v24 = vpop.xlane.xlu1 %122 }
  0xdd   :  { %v106_v25 = vmax.f32 %v105_v23, 1e-24  ;;  %v124_v26 = vmax.f32 %v123_v24, 1e-24 }
  0xdf   :  { %673 = vrsqrt.f32 %v106_v25 }
  0xe0   :  { %675 = vrsqrt.f32 %v124_v26  ;;  %v132_v27 = vpop.xlane.xlu0 %131  ;;  %v89_v28 = vpop.xlane.xlu1 %88 }
  0xe1   :  { %v133_v29 = vmax.f32 %v132_v27, 1e-24  ;;  %v90_v30 = vmax.f32 %v89_v28, 1e-24 }
  0xe3   :  { %677 = vrsqrt.f32 %v133_v29 }
  0xe4   :  { %679 = vrsqrt.f32 %v90_v30 }
  0xe5   :  { %v670_v31 = vpop.eup %669 }
  0xe6   :  { %v672_v32 = vpop.eup %671  ;;  %v117_v33 = vmul.f32 %v670_v31, %v110_v0 }
  0xe7   :  { %v100_v34 = vmul.f32 %v672_v32, %v93_v1  ;;  %v958_v1 = vld [vmem:[#allocation6] sm:$0xff] }
  0xe8   :  { %v118_v35 = vmul.f32 5.0, %v117_v33 }
  0xe9   :  { %v674_v36 = vpop.eup %673 }
  0xea   :  { %v676_v37 = vpop.eup %675  ;;  %645 = vmatpush3.xpose.msk.msra.mxu1 %vm86_vm0, %v118_v35  ;;  %v108_v38 = vmul.f32 %v674_v36, %v101_v2  ;;  %v915_v39 = vmul.f32 %v118_v35, %v100_v34 }
  0xeb   :  { %v126_v40 = vmul.f32 %v676_v37, %v119_v6  ;;  %654 = vmatprep.subr.mxu1 %v809_v18 }
  0xec   :  { %v109_v41 = vmul.f32 5.0, %v108_v38  ;;  %v147_v15 = vsel %vm86_vm0, %v915_v39, 0.0 }
  0xed   :  { %v678_v42 = vpop.eup %677  ;;  %647 = vmatmul.mubr.msk.f32.vlgmr.msra.gmra.mrb[0].mxu1 %vm86_vm0, %v100_v34  ;;  %v127_v45 = vmul.f32 5.0, %v126_v40 }
  0xee   :  { %v680_v43 = vpop.eup %679  ;;  %640 = vmatpush3.xpose.msk.msra.mxu0 %vm86_vm0, %v109_v41  ;;  %v135_v44 = vmul.f32 %v678_v42, %v128_v8  ;;  %656 = vmatprep.mubr.msk.f32.mxu1 %vm810_vm1, %v809_v18 }
  0xef   :  { %v92_v46 = vmul.f32 %v680_v43, %v84_v9  ;;  %649 = vmatprep.subr.mxu0 %v809_v18 }
  0xf0   :  { %655 = vmatpush3.xpose.msk.msra.mxu1 %vm86_vm0, %v135_v44 }
  0xf1   :  { %642 = vmatmul.mubr.msk.f32.vlgmr.msra.gmra.mrb[0].mxu0 %vm86_vm0, %v92_v46  ;;  %v925_v47 = vmul.f32 %v109_v41, %v92_v46  ;;  %v927_v48 = vmul.f32 %v135_v44, %v92_v46 }
  0xf2   :  { %650 = vmatpush3.xpose.msk.msra.mxu0 %vm86_vm0, %v127_v45  ;;  %651 = vmatprep.mubr.msk.f32.mxu0 %vm810_vm1, %v809_v18 }
  0xf3   :  { %657 = vmatmul.mubr.msk.f32.vlgmr.msra.gmra.mrb[2].mxu1 %vm86_vm0, %v92_v46  ;;  %v141_v16 = vsel %vm86_vm0, %v925_v47, 0.0  ;;  %v152_v42 = vsel %vm86_vm0, %v927_v48, 0.0 }
  0xf5   :  { %652 = vmatmul.mubr.msk.f32.vlgmr.msra.gmra.mrb[2].mxu0 %vm86_vm0, %v100_v34 }
 0x1c0   :  { %v948_v50 = vpop.f32.mrb[0].mxu1 }
 0x1c1   :  { %v648_v51 = vpop.f32.mrb[1].mxu1  ;;  %v335_v61 = vsel %vm233_vm3, %v948_v50, -inf }
 0x1c4   :  { %v950_v52 = vpop.f32.mrb[0].mxu0 }
 0x1c5   :  { %v643_v53 = vpop.f32.mrb[1].mxu0  ;;  %v234_v60 = vsel %vm233_vm3, %v950_v52, -inf }
 0x1c6   :  { %v524_v54 = vpop.f32.mrb[2].mxu1  ;;  %v436_v53 = vld [vmem:[#allocation7] sm:$0xff] }
 0x1c7   :  { %v658_v55 = vpop.f32.mrb[3].mxu1  ;;  %v529_v56 = vsel %vm233_vm3, %v524_v54, -inf }
 0x1c8   :  { %530 = vmax.xlane.f32.xlu0 %v529_v56  ;;  %v427_v57 = vpop.f32.mrb[2].mxu0 }
 0x1c9   :  { %v653_v58 = vpop.f32.mrb[3].mxu0  ;;  %v432_v59 = vsel %vm233_vm3, %v427_v57, -inf }
 0x1ca   :  { %433 = vmax.xlane.f32.xlu1 %v432_v59  ;;  %v339_v58 = vld [vmem:[#allocation5] sm:$0xff] }
 0x1cb   :  { %v540_v59 = vld [vmem:[#allocation9] sm:$0xff] }
 0x1cc   :  { %235 = vmax.xlane.f32.xlu0 %v234_v60 }
 0x1ce   :  { %336 = vmax.xlane.f32.xlu1 %v335_v61 }
 0x255   :  { %v531_v0 = vpop.xlane.xlu0 %530 }
 0x256   :  { %v532_v2 = vmax.f32 %v528_v63, %v531_v0 }
 0x257   :  { %v434_v3 = vpop.xlane.xlu1 %433 }
 0x258   :  { %v962_v5 = vsub.f32 %v528_v63, %v532_v2  ;;  %566 = vst.msk [vmem:[#allocation8] sm:$0xff] %vm74_vm2, %v532_v2  ;;  %v435_v6 = vmax.f32 %v958_v1, %v434_v3  ;;  %535 = vperm.xlu0 %667, %v532_v2   ;;  %v553_v2 = vld [vmem:[#allocation10] sm:$0xff] }
 0x259   :  { %v236_v7 = vpop.xlane.xlu0 %235 }
 0x25a   :  { %v437_v8 = vsub.f32 %v958_v1, %v435_v6  ;;  %454 = vst.msk [vmem:[#allocation6] sm:$0xff] %vm74_vm2, %v435_v6  ;;  %v969_v9 = vmax.f32 %v960_v4, %v236_v7  ;;  %v541_v45 = vmul.f32 5.0, %v962_v5  ;;  %v554_v49 = vmul.f32 2.5, %v962_v5 }
 0x25b   :  { %v337_v11 = vpop.xlane.xlu1 %336 }
 0x25c   :  { %v239_v12 = vsub.f32 %v960_v4, %v969_v9  ;;  %257 = vst.msk [vmem:[#allocation2] sm:$0xff] %vm74_vm2, %v969_v9  ;;  %245 = vperm.xlu1 %668, %v969_v9   ;;  %v338_v13 = vmax.f32 %v334_v10, %v337_v11  ;;  %v438_v46 = vmul.f32 1.442695, %v437_v8  ;;  %v542_v47 = vmul.f32 1.442695, %v541_v45  ;;  %v238_v8 = vld [vmem:[#allocation3] sm:$0xff] }
 0x25d   :  { %v555_v51 = vmul.f32 1.442695, %v554_v49 }
 0x25e   :  { %v340_v14 = vsub.f32 %v334_v10, %v338_v13  ;;  %357 = vst.msk [vmem:[#allocation4] sm:$0xff] %vm74_vm2, %v338_v13  ;;  %v240_v48 = vmul.f32 1.442695, %v239_v12 }
 0x260   :  { %443 = vperm.xlu1 %668, %v435_v6  }
 0x264   :  { %346 = vperm.xlu1 %668, %v338_v13  }
 0x277   :  { %148 = vadd.xlane.f32.xlu0 %v147_v15 }
 0x288   :  { %142 = vadd.xlane.f32.xlu1 %v141_v16 }
 0x2d7   :  { %v536_v17 = vpop.permute.xlu0 %535 }
 0x2d8   :  { %v538_v18 = vsub.f32 %v524_v54, %v536_v17 }
 0x2da   :  { %v545_v20 = vmul.f32 5.0, %v538_v18  ;;  %v558_v24 = vmul.f32 2.5, %v538_v18 }
 0x2db   :  { %v246_v19 = vpop.permute.xlu1 %245 }
 0x2dc   :  { %v546_v23 = vmul.f32 1.442695, %v545_v20  ;;  %v559_v28 = vmul.f32 1.442695, %v558_v24  ;;  %v248_v29 = vsub.f32 %v950_v52, %v246_v19  ;;  %v585_v20 = vld [vmem:[#allocation8] sm:$0xff] }
 0x2dd   :  { %v586_v24 = vmul.f32 5.0, %v585_v20 }
 0x2de   :  { %v249_v31 = vmul.f32 1.442695, %v248_v29 }
 0x2df   :  { %v444_v21 = vpop.permute.xlu1 %443 }
 0x2e0   :  { %v446_v22 = vsub.f32 %v427_v57, %v444_v21 }
 0x2e2   :  { %v447_v25 = vmul.f32 1.442695, %v446_v22 }
 0x2e3   :  { %v347_v26 = vpop.permute.xlu1 %346 }
 0x2e4   :  { %681 = vpow2.f32 %v447_v25  ;;  %v349_v27 = vsub.f32 %v948_v50, %v347_v26  ;;  %v341_v50 = vmul.f32 1.442695, %v340_v14 }
 0x2e5   :  { %683 = vpow2.f32 %v546_v23 }
 0x2e6   :  { %v350_v30 = vmul.f32 1.442695, %v349_v27 }
 0x2e8   :  { %685 = vpow2.f32 %v350_v30  ;;  %v591_v30 = vmul.f32 2.5, %v585_v20 }
 0x2e9   :  { %687 = vpow2.f32 %v559_v28  ;;  %v580_v28 = vld [vmem:[#allocation6] sm:$0xff] }
 0x2ea   :  { %689 = vpow2.f32 %v249_v31 }
 0x2eb   :  { %691 = vpow2.f32 %v438_v46 }
 0x2ec   :  { %693 = vpow2.f32 %v542_v47 }
 0x2ed   :  { %695 = vpow2.f32 %v341_v50 }
 0x2ee   :  { %v682_v32 = vpop.eup %681  ;;  %697 = vpow2.f32 %v555_v51 }
 0x2ef   :  { %v449_v33 = vsel %vm233_vm3, %v682_v32, 0.0  ;;  %v684_v34 = vpop.eup %683  ;;  %699 = vpow2.f32 %v240_v48 }
 0x2f0   :  { %450 = vadd.xlane.f32.xlu1 %v449_v33  ;;  %v548_v36 = vsel %vm233_vm3, %v684_v34, 0.0 }
 0x2f2   :  { %v686_v35 = vpop.eup %685 }
 0x2f3   :  { %v352_v37 = vsel %vm233_vm3, %v686_v35, 0.0  ;;  %v688_v38 = vpop.eup %687 }
 0x2f4   :  { %549 = vadd.xlane.f32.xlu1 %v548_v36  ;;  %353 = vadd.xlane.f32.xlu0 %v352_v37  ;;  %v561_v39 = vsel %vm233_vm3, %v688_v38, 0.0  ;;  %v690_v40 = vpop.eup %689 }
 0x2f5   :  { %v251_v41 = vsel %vm233_vm3, %v690_v40, 0.0  ;;  %v692_v52 = vpop.eup %691 }
 0x2f6   :  { %v694_v54 = vpop.eup %693  ;;  %v440_v55 = vmul.f32 %v692_v52, %v436_v53 }
 0x2f7   :  { %v696_v56 = vpop.eup %695  ;;  %v544_v62 = vmul.f32 %v694_v54, %v540_v59 }
 0x2f8   :  { %562 = vadd.xlane.f32.xlu1 %v561_v39  ;;  %v343_v61 = vmul.f32 %v696_v56, %v339_v58  ;;  %v698_v63 = vpop.eup %697  ;;  %v575_v39 = vld [vmem:[#allocation4] sm:$0xff] }
 0x2f9   :  { %v557_v5 = vmul.f32 %v698_v63, %v553_v2  ;;  %v700_v6 = vpop.eup %699 }
 0x2fa   :  { %v242_v11 = vmul.f32 %v700_v6, %v238_v8 }
 0x2fc   :  { %252 = vadd.xlane.f32.xlu1 %v251_v41 }
 0x300   :  { %153 = vadd.xlane.f32.xlu1 %v152_v42 }
 0x304   :  { %v149_v43 = vpop.xlane.xlu0 %148 }
 0x305   :  { %150 = vst.msk [vmem:[#allocation12] sm:$0xff] %vm74_vm2, %v149_v43 }
 0x30c   :  { %v598_v49 = vld [vmem:[#allocation12] sm:$0xff] }
 0x315   :  { %v143_v44 = vpop.xlane.xlu1 %142 }
 0x316   :  { %145 = vst.msk [vmem:[#allocation11] sm:$0xff] %vm74_vm2, %v143_v44  ;;  %v570_v44 = vld [vmem:[#allocation2] sm:$0xff] }
 0x31d   :  { %v596_v50 = vld [vmem:[#allocation11] sm:$0xff] }
 0x37d   :  { %v451_v57 = vpop.xlane.xlu1 %450 }
 0x37e   :  { %v452_v60 = vadd.f32 %v451_v57, %v440_v55 }
 0x380   :  { %453 = vst.msk [vmem:[#allocation7] sm:$0xff] %vm74_vm2, %v452_v60 }
 0x381   :  { %v354_v0 = vpop.xlane.xlu0 %353  ;;  %v550_v1 = vpop.xlane.xlu1 %549 }
 0x382   :  { %v355_v3 = vadd.f32 %v354_v0, %v343_v61  ;;  %v551_v4 = vadd.f32 %v550_v1, %v544_v62 }
 0x384   :  { %356 = vst.msk [vmem:[#allocation5] sm:$0xff] %vm74_vm2, %v355_v3  ;;  %552 = vst.msk [vmem:[#allocation9] sm:$0xff] %vm74_vm2, %v551_v4 }
 0x385   :  { %v563_v7 = vpop.xlane.xlu1 %562 }
 0x386   :  { %v564_v9 = vadd.f32 %v563_v7, %v557_v5 }
 0x387   :  { %v581_v10 = vld [vmem:[#allocation7] sm:$0xff] }
 0x388   :  { %565 = vst.msk [vmem:[#allocation10] sm:$0xff] %vm74_vm2, %v564_v9  ;;  %701 = vlog2.f32 %v581_v10 }
 0x389   :  { %v253_v12 = vpop.xlane.xlu1 %252 }
 0x38a   :  { %v254_v13 = vadd.f32 %v253_v12, %v242_v11 }
 0x38b   :  { %v576_v14 = vld [vmem:[#allocation5] sm:$0xff] }
 0x38c   :  { %v587_v15 = vld [vmem:[#allocation9] sm:$0xff]  ;;  %256 = vst.msk [vmem:[#allocation3] sm:$0xff] %vm74_vm2, %v254_v13 }
 0x38d   :  { %703 = vlog2.f32 %v587_v15  ;;  %v154_v16 = vpop.xlane.xlu1 %153 }
 0x38e   :  { %705 = vlog2.f32 %v576_v14  ;;  %155 = vst.msk [vmem:[#allocation13] sm:$0xff] %vm74_vm2, %v154_v16 }
 0x38f   :  { %v592_v17 = vld [vmem:[#allocation10] sm:$0xff] }
 0x390   :  { %707 = vlog2.f32 %v592_v17 }
 0x392   :  { %v702_v19 = vpop.eup %701 }
 0x393   :  { %v571_v18 = vld [vmem:[#allocation3] sm:$0xff]  ;;  %v583_v22 = vmul.f32 0.6931472, %v702_v19 }
 0x394   :  { %709 = vlog2.f32 %v571_v18 }
 0x395   :  { %v602_v26 = vld [vmem:[#allocation13] sm:$0xff]  ;;  %v584_v32 = vadd.f32 %v583_v22, %v580_v28 }
 0x396   :  { %v603_v34 = vmul.f32 5.0, %v602_v26  ;;  %v607_v37 = vmul.f32 2.5, %v602_v26 }
 0x397   :  { %v704_v21 = vpop.eup %703 }
 0x398   :  { %v706_v23 = vpop.eup %705  ;;  %v589_v25 = vmul.f32 0.6931472, %v704_v21  ;;  %v605_v42 = vsub.f32 %v584_v32, %v603_v34 }
 0x399   :  { %v578_v31 = vmul.f32 0.6931472, %v706_v23 }
 0x39a   :  { %v708_v27 = vpop.eup %707  ;;  %v590_v29 = vadd.f32 %v589_v25, %v586_v24 }
 0x39b   :  { %v594_v33 = vmul.f32 0.6931472, %v708_v27  ;;  %v579_v40 = vadd.f32 %v578_v31, %v575_v39 }
 0x39c   :  { %v604_v36 = vsub.f32 %v590_v29, %v603_v34 }
 0x39d   :  { %v595_v35 = vadd.f32 %v594_v33, %v591_v30  ;;  %v599_v51 = vsub.f32 %v579_v40, %v598_v49 }
 0x39e   :  { %v710_v38 = vpop.eup %709  ;;  %v606_v46 = vadd.f32 %v605_v42, %v604_v36 }
 0x39f   :  { %v573_v41 = vmul.f32 0.6931472, %v710_v38  ;;  %v608_v43 = vsub.f32 %v595_v35, %v607_v37 }
 0x3a1   :  { %v574_v45 = vadd.f32 %v573_v41, %v570_v44  ;;  %v609_v47 = vmul.f32 2.0, %v608_v43 }
 0x3a3   :  { %v597_v48 = vsub.f32 %v574_v45, %v596_v50  ;;  %v610_v52 = vadd.f32 %v609_v47, %v606_v46 }
 0x3a5   :  { %v600_v53 = vadd.f32 %v599_v51, %v597_v48  ;;  %v611_v54 = vmul.f32 0.5, %v610_v52 }
 0x3a7   :  { %v601_v55 = vmul.f32 0.5, %v600_v53  ;;  %v612_v56 = vmul.f32 0.5, %v611_v54 }
 0x3a9   :  { %v613_v57 = vmul.f32 0.5, %v601_v55 }
 0x3ab   :  { %v614_v58 = vadd.f32 %v613_v57, %v612_v56 }
 0x3ad   :  { %615 = vst.msk [vmem:[%s1010_s6] sm:$0xff] %vm74_vm2, %v614_v58 }
 0x3ae   :  { %620 = vsyncpa [#allocation15], 1 }
 0x3af   :  { %621 = vsyncpa [#allocation17], 1 }
 0x3b0   :  { %622 = vsyncpa [#allocation20], 1 }

</bundles_post_ra>
